<compile_context>
chip_gen: v5e
topology: v5e:2x2
jax: 0.10.0
libtpu: 0.0.40
codegen_flags: <defaults>
</compile_context>

<pallas_src>
import numpy as np
import jax
import jax.numpy as jnp
from jax.experimental import pallas as pl
from jax.experimental.pallas import tpu as pltpu


def _round_up(n, m):
    return ((n + m - 1) // m) * m


def _embed_kernel(x_ref, w1_ref, b1_ref, w2_ref, b2_ref, coef_ref, ind_ref,
                  out_ref):
    # Lane-dense throughout: the activation last dim is J*D (= 256 here).
    x = x_ref[...].astype(jnp.float32)        # (TB, J*3)
    coef = coef_ref[...].astype(jnp.float32)  # (TB, J)

    # Linear(3 -> D) for all J joints at once: block-diagonal first layer on
    # the MXU (K = J*3 = 24).  Result is already (TB, J*D) -- no reshape.
    h = jnp.dot(x, w1_ref[...], preferred_element_type=jnp.float32)
    h = h + b1_ref[...]                       # (1, J*D) broadcast
    h = h * jax.nn.sigmoid(h)                 # SiLU, lane-dense on VPU/EUP

    # Expand per-(sample, joint) weighted-sum coefficient to (TB, J*D) with a
    # tiny 0/1 indicator matmul (MXU slack is large; avoids broadcast VALU +
    # padded-VMEM coef blocks).
    coef_exp = jnp.dot(coef, ind_ref[...], preferred_element_type=jnp.float32)
    hw = h * coef_exp                         # (TB, J*D)

    # Fuse the J per-joint Linear(D->D) layers + the weighted sum over joints
    # into one stacked-K matmul: (TB, J*D) @ (J*D, D).  With N = D = 32 the
    # MXU has plenty of slack -- the binding resource is the (now lane-dense)
    # elementwise phase above.
    acc = jnp.dot(hw, w2_ref[...], preferred_element_type=jnp.float32)

    # Weighted bias term sum_j coef[b, j] * b2[j, :] as another small matmul
    # (instead of a 25%-lane temporary + cross-sublane reduction).
    acc = acc + jnp.dot(coef, b2_ref[...], preferred_element_type=jnp.float32)

    out_ref[...] = acc.astype(out_ref.dtype)


def embed_target_loc_multi(x_bj3, w1, b1, w2, b2, ws_weights, active_mask,
                           *, block_b=512):
    """
    x_bj3      : (B, J, 3)            -- PyTorch-layout input
    w1         : (J, 3, D)  b1: (J, D)
    w2         : (J, D, D)  b2: (J, D)
    ws_weights : (J,)                 -- WeightedSum learnable weights
    active_mask: (B, J) float32       -- 1.0 where joint j is active for sample b
    returns    : (B, D)
    """
    B, J, _ = x_bj3.shape
    D = w1.shape[-1]
    J3, JD = J * 3, J * D

    # ---- one-time, tiny parameter prep (host side; cacheable) ----
    # Block-diagonal first layer: rows j*3..j*3+2, cols j*D..(j+1)*D-1 = w1[j].
    eye_j = jnp.eye(J, dtype=jnp.float32)
    w1_bd = (eye_j[:, None, :, None] *
             w1.astype(jnp.float32)[:, :, None, :]).reshape(J3, JD)
    b1_flat = b1.astype(jnp.float32).reshape(1, JD)
    w2s = w2.astype(jnp.float32).reshape(JD, D)           # stacked along K
    b2f = b2.astype(jnp.float32)                           # (J, D)
    # 0/1 indicator: joint j -> lanes [j*D, (j+1)*D)
    ind = jnp.repeat(eye_j, D, axis=1)                     # (J, J*D)

    sw = jax.nn.softmax(ws_weights.astype(jnp.float32))    # (J,)
    coef = active_mask.astype(jnp.float32) * sw[None, :]   # (B, J)

    x_flat = x_bj3.astype(jnp.float32).reshape(B, J3)      # (B, J*3), contiguous

    # ---- batch tiling ----
    Bp = _round_up(max(B, 8), 8)                 # 8-aligned even at tiny B
    TB = min(block_b, Bp)
    if Bp >= 16 and Bp // TB < 2:
        # Give the v7x megacore (2 TCs) at least two "parallel" grid steps.
        TB = _round_up(-(-Bp // 2), 8)
    Bp = _round_up(Bp, TB)

    if Bp != B:
        x_flat = jnp.pad(x_flat, ((0, Bp - B), (0, 0)))
        coef = jnp.pad(coef, ((0, Bp - B), (0, 0)))        # zero coef -> zero rows

    grid = (Bp // TB,)

    cost = pl.CostEstimate(
        flops=int(Bp * (2 * J3 * JD + 2 * J * JD + 2 * JD * D + 2 * J * D
                        + 4 * JD)),
        transcendentals=int(Bp * JD),
        bytes_accessed=int(4 * (Bp * (J3 + J + D)
                                + J3 * JD + JD + JD * D + J * D + J * JD)),
    )

    out = pl.pallas_call(
        _embed_kernel,
        out_shape=jax.ShapeDtypeStruct((Bp, D), x_bj3.dtype),
        grid=grid,
        in_specs=[
            pl.BlockSpec((TB, J3), lambda i: (i, 0)),   # x, batch-tiled, contiguous
            pl.BlockSpec((J3, JD), lambda i: (0, 0)),   # block-diag W1 (resident)
            pl.BlockSpec((1, JD), lambda i: (0, 0)),    # b1 (resident)
            pl.BlockSpec((JD, D), lambda i: (0, 0)),    # stacked W2 (resident)
            pl.BlockSpec((J, D), lambda i: (0, 0)),     # b2 (resident)
            pl.BlockSpec((TB, J), lambda i: (i, 0)),    # coef, batch-tiled
            pl.BlockSpec((J, JD), lambda i: (0, 0)),    # 0/1 indicator (resident)
        ],
        out_specs=pl.BlockSpec((TB, D), lambda i: (i, 0)),
        compiler_params=pltpu.CompilerParams(
            dimension_semantics=("parallel",)),
        cost_estimate=cost,
    )(x_flat, w1_bd, b1_flat, w2s, b2f, coef, ind)

    return out[:B]


def _reference(x_bj3, w1, b1, w2, b2, ws_weights, active_mask):
    sw = jax.nn.softmax(ws_weights)
    h = jnp.einsum("bjk,jkd->bjd", x_bj3, w1) + b1[None]
    h = h * jax.nn.sigmoid(h)
    e = jnp.einsum("bjc,jcd->bjd", h, w2) + b2[None]
    return jnp.einsum("bjd,j,bj->bd", e, sw, active_mask)


if __name__ == "__main__":
    # Module config (small, consistent with the forward pass)
    all_goal_joint_names = ["pelvis", "left_wrist", "right_wrist",
                            "head", "left_foot", "right_foot"]
    extended_names = all_goal_joint_names + ["traj", "heading"]
    joint_idx = {n: i for i, n in enumerate(extended_names)}
    J = len(extended_names)          # 8
    D = 32                           # latent_dim
    B = 2                            # batch

    key = jax.random.PRNGKey(0)
    k_x, k_w1, k_b1, k_w2, k_b2, k_ws = jax.random.split(key, 6)

    # Deterministic synthetic parameters (one MLP per extended joint)
    w1 = jax.random.normal(k_w1, (J, 3, D), jnp.float32) * 0.5
    b1 = jax.random.normal(k_b1, (J, D), jnp.float32) * 0.1
    w2 = jax.random.normal(k_w2, (J, D, D), jnp.float32) * (1.0 / np.sqrt(D))
    b2 = jax.random.normal(k_b2, (J, D), jnp.float32) * 0.1
    ws_weights = jax.random.normal(k_ws, (J,), jnp.float32)

    # Inputs (PyTorch layout: input[b, joint, 3])
    x = jax.random.normal(k_x, (B, J, 3), jnp.float32)

    # target_joint_names / target_heading -> per-sample active mask (host-side;
    # string handling has no device equivalent).
    target_joint_names = [["pelvis", "left_wrist"],
                          ["head", "traj", "right_foot"]]
    target_heading = [True, False]
    mask_np = np.zeros((B, J), np.float32)
    for b, names in enumerate(target_joint_names):
        names = list(names) + (["heading"] if target_heading[b] else [])
        for n in names:
            mask_np[b, joint_idx[n]] = 1.0
    active_mask = jnp.asarray(mask_np)

    out = embed_target_loc_multi(x, w1, b1, w2, b2, ws_weights, active_mask)
    out = jax.block_until_ready(out)

    ref = _reference(x, w1, b1, w2, b2, ws_weights, active_mask)
    assert out.shape == (B, D)
    np.testing.assert_allclose(np.asarray(out), np.asarray(ref),
                               rtol=1e-5, atol=1e-4)
    print("KERNEL_OK")
</pallas_src>

<mosaic_0001>
module attributes {stable_mosaic.version = 11 : i64} {
  func.func @_embed_kernel(%arg0: i32, %arg1: memref<8x24xf32, #tpu.memory_space<vmem>>, %arg2: memref<24x256xf32, #tpu.memory_space<vmem>>, %arg3: memref<1x256xf32, #tpu.memory_space<vmem>>, %arg4: memref<256x32xf32, #tpu.memory_space<vmem>>, %arg5: memref<8x32xf32, #tpu.memory_space<vmem>>, %arg6: memref<8x8xf32, #tpu.memory_space<vmem>>, %arg7: memref<8x256xf32, #tpu.memory_space<vmem>>, %arg8: memref<8x32xf32, #tpu.memory_space<vmem>>) attributes {dimension_semantics = [#tpu.dimension_semantics<parallel>], iteration_bounds = array<i64: 1>, scalar_prefetch = 0 : i64, scratch_operands = 0 : i64, tpu.core_type = #tpu.core_type<tc>, window_params = [{transform_indices = @transform_0, window_bounds = array<i64: 8, 24>}, {pipeline_mode = #tpu.pipeline_mode<synchronous>, transform_indices = @transform_1, window_bounds = array<i64: 24, 256>}, {pipeline_mode = #tpu.pipeline_mode<synchronous>, transform_indices = @transform_2, window_bounds = array<i64: 1, 256>}, {pipeline_mode = #tpu.pipeline_mode<synchronous>, transform_indices = @transform_3, window_bounds = array<i64: 256, 32>}, {pipeline_mode = #tpu.pipeline_mode<synchronous>, transform_indices = @transform_4, window_bounds = array<i64: 8, 32>}, {transform_indices = @transform_5, window_bounds = array<i64: 8, 8>}, {pipeline_mode = #tpu.pipeline_mode<synchronous>, transform_indices = @transform_6, window_bounds = array<i64: 8, 256>}, {transform_indices = @transform_7, window_bounds = array<i64: 8, 32>}]} {
    %c0 = arith.constant 0 : index
    %c0_0 = arith.constant 0 : index
    %0 = vector.load %arg1[%c0, %c0_0] : memref<8x24xf32, #tpu.memory_space<vmem>>, vector<8x24xf32>
    %c0_1 = arith.constant 0 : index
    %c0_2 = arith.constant 0 : index
    %1 = vector.load %arg6[%c0_1, %c0_2] : memref<8x8xf32, #tpu.memory_space<vmem>>, vector<8x8xf32>
    %c0_3 = arith.constant 0 : index
    %c0_4 = arith.constant 0 : index
    %2 = vector.load %arg2[%c0_3, %c0_4] : memref<24x256xf32, #tpu.memory_space<vmem>>, vector<24x256xf32>
    %cst = arith.constant dense<0.000000e+00> : vector<8x256xf32>
    %3 = tpu.matmul %0, %2, %cst {dimension_numbers = #tpu.dot_dimension_numbers<[1], [0], [0], [1], [0, 0, 1, 1], [], []>} : vector<8x24xf32>, vector<24x256xf32>, vector<8x256xf32> -> vector<8x256xf32>
    %c0_5 = arith.constant 0 : index
    %c0_6 = arith.constant 0 : index
    %4 = vector.load %arg3[%c0_5, %c0_6] : memref<1x256xf32, #tpu.memory_space<vmem>>, vector<1x256xf32>
    %5 = vector.broadcast %4 : vector<1x256xf32> to vector<8x256xf32>
    %6 = arith.addf %3, %5 : vector<8x256xf32>
    %7 = arith.negf %6 : vector<8x256xf32>
    %8 = math.exp %7 : vector<8x256xf32>
    %cst_7 = arith.constant 1.000000e+00 : f32
    %9 = vector.broadcast %cst_7 : f32 to vector<8x256xf32>
    %10 = arith.addf %9, %8 : vector<8x256xf32>
    %11 = arith.divf %9, %10 : vector<8x256xf32>
    %12 = arith.mulf %6, %11 : vector<8x256xf32>
    %c0_8 = arith.constant 0 : index
    %c0_9 = arith.constant 0 : index
    %13 = vector.load %arg7[%c0_8, %c0_9] : memref<8x256xf32, #tpu.memory_space<vmem>>, vector<8x256xf32>
    %cst_10 = arith.constant dense<0.000000e+00> : vector<8x256xf32>
    %14 = tpu.matmul %1, %13, %cst_10 {dimension_numbers = #tpu.dot_dimension_numbers<[1], [0], [0], [1], [0, 0, 1, 1], [], []>} : vector<8x8xf32>, vector<8x256xf32>, vector<8x256xf32> -> vector<8x256xf32>
    %15 = arith.mulf %12, %14 : vector<8x256xf32>
    %c0_11 = arith.constant 0 : index
    %c0_12 = arith.constant 0 : index
    %16 = vector.load %arg4[%c0_11, %c0_12] : memref<256x32xf32, #tpu.memory_space<vmem>>, vector<256x32xf32>
    %cst_13 = arith.constant dense<0.000000e+00> : vector<8x32xf32>
    %17 = tpu.matmul %15, %16, %cst_13 {dimension_numbers = #tpu.dot_dimension_numbers<[1], [0], [0], [1], [0, 0, 1, 1], [], []>} : vector<8x256xf32>, vector<256x32xf32>, vector<8x32xf32> -> vector<8x32xf32>
    %c0_14 = arith.constant 0 : index
    %c0_15 = arith.constant 0 : index
    %18 = vector.load %arg5[%c0_14, %c0_15] : memref<8x32xf32, #tpu.memory_space<vmem>>, vector<8x32xf32>
    %cst_16 = arith.constant dense<0.000000e+00> : vector<8x32xf32>
    %19 = tpu.matmul %1, %18, %cst_16 {dimension_numbers = #tpu.dot_dimension_numbers<[1], [0], [0], [1], [0, 0, 1, 1], [], []>} : vector<8x8xf32>, vector<8x32xf32>, vector<8x32xf32> -> vector<8x32xf32>
    %20 = arith.addf %17, %19 : vector<8x32xf32>
    %c0_17 = arith.constant 0 : index
    %c0_18 = arith.constant 0 : index
    %21 = vector.load %arg8[%c0_17, %c0_18] : memref<8x32xf32, #tpu.memory_space<vmem>>, vector<8x32xf32>
    tpu.vector_store %arg8[%c0_17, %c0_18], %20 {strides = array<i32>} : memref<8x32xf32, #tpu.memory_space<vmem>>, vector<8x32xf32>,
    return
  }
  func.func @transform_0(%arg0: i32) -> (i32, i32) {
    %c0_i32 = arith.constant 0 : i32
    %c0_i32_0 = arith.constant 0 : i32
    return %arg0, %c0_i32 : i32, i32
  }
  func.func @transform_1(%arg0: i32) -> (i32, i32) {
    %c0_i32 = arith.constant 0 : i32
    %c0_i32_0 = arith.constant 0 : i32
    %c0_i32_1 = arith.constant 0 : i32
    return %c0_i32, %c0_i32_0 : i32, i32
  }
  func.func @transform_2(%arg0: i32) -> (i32, i32) {
    %c0_i32 = arith.constant 0 : i32
    %c0_i32_0 = arith.constant 0 : i32
    %c0_i32_1 = arith.constant 0 : i32
    return %c0_i32, %c0_i32_0 : i32, i32
  }
  func.func @transform_3(%arg0: i32) -> (i32, i32) {
    %c0_i32 = arith.constant 0 : i32
    %c0_i32_0 = arith.constant 0 : i32
    %c0_i32_1 = arith.constant 0 : i32
    return %c0_i32, %c0_i32_0 : i32, i32
  }
  func.func @transform_4(%arg0: i32) -> (i32, i32) {
    %c0_i32 = arith.constant 0 : i32
    %c0_i32_0 = arith.constant 0 : i32
    %c0_i32_1 = arith.constant 0 : i32
    return %c0_i32, %c0_i32_0 : i32, i32
  }
  func.func @transform_5(%arg0: i32) -> (i32, i32) {
    %c0_i32 = arith.constant 0 : i32
    %c0_i32_0 = arith.constant 0 : i32
    return %arg0, %c0_i32 : i32, i32
  }
  func.func @transform_6(%arg0: i32) -> (i32, i32) {
    %c0_i32 = arith.constant 0 : i32
    %c0_i32_0 = arith.constant 0 : i32
    %c0_i32_1 = arith.constant 0 : i32
    return %c0_i32, %c0_i32_0 : i32, i32
  }
  func.func @transform_7(%arg0: i32) -> (i32, i32) {
    %c0_i32 = arith.constant 0 : i32
    %c0_i32_0 = arith.constant 0 : i32
    return %arg0, %c0_i32 : i32, i32
  }
}

</mosaic_0001>

<bundles_post_ra>
// kernel: tpu_custom_call.1
= control target key start
LH: loop header
LB: loop body
LE: loop exit
PB: predicated region body
PF: predicated region fallthrough
CT: control target
= control target key end

     0   :  { %vm127_vm0 = vcmask 64512   ;;  %vm41_vm1 = vcmask 195584   ;;  %s510_s0 = inlined_call_operand.vmem [shape: f32[8,24], index: 0, kind: input, shape index: {}]   ;;  %s511_s1 = inlined_call_operand.vmem [shape: f32[24,256], index: 1, kind: input, shape index: {}]   ;;  %s512_s2 = inlined_call_operand.vmem [shape: f32[1,256], index: 2, kind: input, shape index: {}]   ;;  %s513_s3 = inlined_call_operand.vmem [shape: f32[256,32], index: 3, kind: input, shape index: {}]   ;;  %s514_s4 = inlined_call_operand.vmem [shape: f32[8,32], index: 4, kind: input, shape index: {}]   ;;  %s515_s5 = inlined_call_operand.vmem [shape: f32[8,8], index: 5, kind: input, shape index: {}]   ;;  %s516_s6 = inlined_call_operand.vmem [shape: f32[8,256], index: 6, kind: input, shape index: {}]   ;;  %s517_s7 = inlined_call_operand.hbm [shape: f32[8,32], index: 7, kind: output, shape index: {}]  }
   0x1   :  { %v33_v0 = vld [vmem:[%s511_s1 + $0x20] sm:$0xff]  ;;  %v31_v1 = vld [vmem:[%s511_s1 + $0x10] sm:$0xff]  ;;  %v126_v6 = vld [vmem:[%s516_s6 + $0x8] sm:$0xff] }
   0x2   :  { %58 = vmatpush.msra.mxu1 %v33_v0  ;;  %v29_v2 = vld [vmem:[%s511_s1] sm:$0xff] }
   0x3   :  { %v125_v3 = vld [vmem:[%s516_s6] sm:$0xff] }
   0x4   :  { %v382_v4 = vld [vmem:[%s515_s5] sm:$0xff]  ;;  %59 = vmatpush.msra.mxu1 %v31_v1  ;;  %146 = vmatpush.msra.mxu2 %v125_v3 }
   0x5   :  { %v27_v5 = vld [vmem:[%s510_s0] sm:$0xff] }
   0x6   :  { %12 = vsyncpa [#allocation3], 0  ;;  %v34_v7 = vld [vmem:[%s511_s1 + $0x28] sm:$0xff]  ;;  %288 = vmatmul.msk.f32.vlgmr.msra.gmra.mxu2 %vm127_vm0, %v382_v4  ;;  %60 = vmatpush.msra.mxu1 %v29_v2  ;;  %v32_v8 = vld [vmem:[%s511_s1 + $0x18] sm:$0xff]  ;;  %s275_s9 = sshll.u32 %s517_s7, 4  ;;  %vm266_vm10 = vcmask 261120   ;;  %s276_s9 = int_to_ptr.hbm [resolvable:$true] %s275_s9 }
   0x7   :  { %166 = vmatpush.msrb.mxu2 %v126_v6  ;;  %284 = vmatmul.msk.f32.vlgmr.msra.gmra.mxu1 %vm41_vm1, %v27_v5  ;;  %v30_v9 = vld [vmem:[%s511_s1 + $0x8] sm:$0xff]  ;;  %v188_v10 = vld [vmem:[%s513_s3 + $0x78] sm:$0xff]  ;;  %v187_v11 = vld [vmem:[%s513_s3 + $0x70] sm:$0xff] }
   0x8   :  { %78 = vmatpush.msrb.mxu1 %v34_v7  ;;  %226 = vmatpush.msra.mxu3 %v188_v10  ;;  %v186_v12 = vld [vmem:[%s513_s3 + $0x68] sm:$0xff]  ;;  %v185_v13 = vld [vmem:[%s513_s3 + $0x60] sm:$0xff]  ;;  %v184_v14 = vld [vmem:[%s513_s3 + $0x58] sm:$0xff] }
   0x9   :  { %v204_v15 = vld [vmem:[%s513_s3 + $0xf8] sm:$0xff]  ;;  %v183_v16 = vld [vmem:[%s513_s3 + $0x50] sm:$0xff]  ;;  %v182_v18 = vld [vmem:[%s513_s3 + $0x48] sm:$0xff] }
   0xa   :  { %79 = vmatpush.msrb.mxu1 %v32_v8  ;;  %227 = vmatpush.msra.mxu3 %v187_v11  ;;  %v203_v17 = vld [vmem:[%s513_s3 + $0xf0] sm:$0xff]  ;;  %v202_v19 = vld [vmem:[%s513_s3 + $0xe8] sm:$0xff]  ;;  %v181_v20 = vld [vmem:[%s513_s3 + $0x40] sm:$0xff] }
   0xb   :  { %246 = vmatpush.msra.mxu0 %v204_v15  ;;  %v201_v21 = vld [vmem:[%s513_s3 + $0xe0] sm:$0xff]  ;;  %v180_v22 = vld [vmem:[%s513_s3 + $0x38] sm:$0xff]  ;;  %v179_v24 = vld [vmem:[%s513_s3 + $0x30] sm:$0xff] }
   0xc   :  { %80 = vmatpush.msrb.mxu1 %v30_v9  ;;  %228 = vmatpush.msra.mxu3 %v186_v12  ;;  %v200_v23 = vld [vmem:[%s513_s3 + $0xd8] sm:$0xff]  ;;  %v199_v25 = vld [vmem:[%s513_s3 + $0xd0] sm:$0xff]  ;;  %v178_v26 = vld [vmem:[%s513_s3 + $0x28] sm:$0xff] }
   0xd   :  { %247 = vmatpush.msra.mxu0 %v203_v17  ;;  %v198_v27 = vld [vmem:[%s513_s3 + $0xc8] sm:$0xff]  ;;  %v177_v28 = vld [vmem:[%s513_s3 + $0x20] sm:$0xff]  ;;  %v176_v31 = vld [vmem:[%s513_s3 + $0x18] sm:$0xff] }
   0xe   :  { %289 = vmatmul.msk.f32.vlgmr.msrb.gmra.mxu2 %vm127_vm0, %v382_v4  ;;  %229 = vmatpush.msra.mxu3 %v185_v13  ;;  %v197_v29 = vld [vmem:[%s513_s3 + $0xc0] sm:$0xff]  ;;  %v196_v32 = vld [vmem:[%s513_s3 + $0xb8] sm:$0xff]  ;;  %v175_v34 = vld [vmem:[%s513_s3 + $0x10] sm:$0xff] }
   0xf   :  { %285 = vmatmul.msk.f32.vlgmr.msrb.gmra.mxu1 %vm41_vm1, %v27_v5  ;;  %248 = vmatpush.msra.mxu0 %v202_v19  ;;  %v205_v30 = vld [vmem:[%s514_s4] sm:$0xff]  ;;  %v195_v35 = vld [vmem:[%s513_s3 + $0xb0] sm:$0xff]  ;;  %v174_v37 = vld [vmem:[%s513_s3 + $0x8] sm:$0xff] }
  0x10   :  { %230 = vmatpush.msra.mxu3 %v184_v14  ;;  %221 = vmatpush.msra.mxu2 %v205_v30  ;;  %v35_v33 = vld [vmem:[%s512_s2] sm:$0x3]  ;;  %v194_v38 = vld [vmem:[%s513_s3 + $0xa8] sm:$0xff]  ;;  %v192_v44 = vld [vmem:[%s513_s3 + $0x98] sm:$0xff] }
  0x11   :  { %249 = vmatpush.msra.mxu0 %v201_v21  ;;  %v37_v36 = vperm.slane %v35_v33, 0  ;;  %v173_v41 = vld [vmem:[%s513_s3] sm:$0xff]  ;;  %v191_v45 = vld [vmem:[%s513_s3 + $0x90] sm:$0xff]  ;;  %v38_v46 = vperm.slane %v35_v33, 1  ;;  %v190_v47 = vld [vmem:[%s513_s3 + $0x88] sm:$0xff] }
  0x12   :  { %231 = vmatpush.msra.mxu3 %v183_v16  ;;  %v193_v42 = vld [vmem:[%s513_s3 + $0xa0] sm:$0xff] }
  0x13   :  { %250 = vmatpush.msra.mxu0 %v200_v23  ;;  %v189_v50 = vld [vmem:[%s513_s3 + $0x80] sm:$0xff]  ;;  %s326_s3 = smov [#allocation2]  }
  0x14   :  { %232 = vmatpush.msra.mxu3 %v182_v18  ;;  %s273_s29 = sshll.u32 %s326_s3, 4  ;;  %s274_s29 = int_to_ptr.vmem [resolvable:$true] %s273_s29 }
  0x15   :  { %251 = vmatpush.msra.mxu0 %v199_v25 }
  0x16   :  { %233 = vmatpush.msra.mxu3 %v181_v20  ;;  %290 = vmatmul.msk.f32.vlgmr.msra.gmra.mxu2 %vm127_vm0, %v382_v4 }
  0x17   :  { %252 = vmatpush.msra.mxu0 %v198_v27 }
  0x18   :  { %234 = vmatpush.msra.mxu3 %v180_v22 }
  0x19   :  { %253 = vmatpush.msra.mxu0 %v197_v29 }
  0x1a   :  { %235 = vmatpush.msra.mxu3 %v179_v24 }
  0x1b   :  { %254 = vmatpush.msra.mxu0 %v196_v32 }
  0x1c   :  { %236 = vmatpush.msra.mxu3 %v178_v26 }
  0x1d   :  { %255 = vmatpush.msra.mxu0 %v195_v35 }
  0x1e   :  { %237 = vmatpush.msra.mxu3 %v177_v28 }
  0x1f   :  { %256 = vmatpush.msra.mxu0 %v194_v38 }
  0x20   :  { %238 = vmatpush.msra.mxu3 %v176_v31 }
  0x21   :  { %257 = vmatpush.msra.mxu0 %v193_v42 }
  0x22   :  { %239 = vmatpush.msra.mxu3 %v175_v34 }
  0x23   :  { %258 = vmatpush.msra.mxu0 %v192_v44 }
  0x24   :  { %240 = vmatpush.msra.mxu3 %v174_v37 }
  0x25   :  { %259 = vmatpush.msra.mxu0 %v191_v45 }
  0x26   :  { %241 = vmatpush.msra.mxu3 %v173_v41 }
  0x27   :  { %260 = vmatpush.msra.mxu0 %v190_v47 }
  0x29   :  { %261 = vmatpush.msra.mxu0 %v189_v50 }
  0x84   :  { %v62_v39 = vpop.f32.mrf.mxu1 }
  0x85   :  { %v63_v40 = vadd.f32 %v62_v39, %v37_v36 }
  0x87   :  { %v286_v43 = vmul.f32 -1.442695, %v63_v40 }
  0x89   :  { %292 = vpow2.f32 %v286_v43  ;;  %v148_v1 = vpop.f32.mrf.mxu2 }
  0x8c   :  { %v82_v48 = vpop.f32.mrf.mxu1 }
  0x8d   :  { %v83_v49 = vadd.f32 %v82_v48, %v38_v46 }
  0x8f   :  { %v293_v51 = vpop.eup %292  ;;  %v287_v52 = vmul.f32 -1.442695, %v83_v49 }
  0x90   :  { %v91_v53 = vadd.f32 1.0, %v293_v51 }
  0x91   :  { %294 = vpow2.f32 %v287_v52  ;;  %v168_v15 = vpop.f32.mrf.mxu2 }
  0x92   :  { %296 = vrcp.f32 %v91_v53  ;;  %v104_v59 = vand.u32 2147483648, %v91_v53  ;;  %v102_v61 = vand.u32 2147483647, %v91_v53  ;;  %vm98_vm3 = vweird.f32 %v91_v53 }
  0x94   :  { %v105_v0 = vor.u32 1.1754944e-38, %v104_v59  ;;  %vm103_vm5 = vcmp.eq.f32.partialorder %v102_v61, 8.507059e+37 }
  0x97   :  { %v295_v54 = vpop.eup %294 }
  0x98   :  { %v297_v55 = vpop.eup %296  ;;  %v92_v56 = vadd.f32 1.0, %v295_v54 }
  0x99   :  { %v94_v57 = vmul.f32 %v297_v55, %v91_v53  ;;  %vm99_vm2 = vweird.f32 %v297_v55  ;;  %v223_v18 = vpop.f32.mrf.mxu2 }
  0x9a   :  { %298 = vrcp.f32 %v92_v56  ;;  %vm100_vm4 = vmor %vm98_vm3, %vm99_vm2  ;;  %v119_v7 = vand.u32 2147483648, %v92_v56  ;;  %v117_v10 = vand.u32 2147483647, %v92_v56  ;;  %vm113_vm7 = vweird.f32 %v92_v56 }
  0x9b   :  { %v95_v58 = vsub.f32 1.0, %v94_v57 }
  0x9c   :  { %v120_v12 = vor.u32 1.1754944e-38, %v119_v7  ;;  %vm118_vm9 = vcmp.eq.f32.partialorder %v117_v10, 8.507059e+37 }
  0x9d   :  { %v96_v60 = vmul.f32 %v297_v55, %v95_v58 }
  0x9f   :  { %v97_v62 = vadd.f32 %v297_v55, %v96_v60 }
  0xa0   :  { %v299_v63 = vpop.eup %298 }
  0xa1   :  { %v101_v2 = vsel %vm100_vm4, %v297_v55, %v97_v62  ;;  %v109_v3 = vmul.f32 %v299_v63, %v92_v56  ;;  %vm114_vm6 = vweird.f32 %v299_v63 }
  0xa2   :  { %v106_v4 = vsel %vm103_vm5, %v105_v0, %v101_v2  ;;  %vm115_vm8 = vmor %vm113_vm7, %vm114_vm6 }
  0xa3   :  { %v123_v5 = vmul.f32 %v106_v4, %v63_v40  ;;  %v110_v6 = vsub.f32 1.0, %v109_v3 }
  0xa5   :  { %v171_v8 = vmul.f32 %v148_v1, %v123_v5  ;;  %v111_v9 = vmul.f32 %v299_v63, %v110_v6 }
  0xa7   :  { %242 = vmatmul.f32.vlgmr.msra.gmra.mxu3 %v171_v8  ;;  %v112_v11 = vadd.f32 %v299_v63, %v111_v9 }
  0xa9   :  { %v116_v13 = vsel %vm115_vm8, %v299_v63, %v112_v11 }
  0xaa   :  { %v121_v14 = vsel %vm118_vm9, %v120_v12, %v116_v13 }
  0xab   :  { %v124_v16 = vmul.f32 %v121_v14, %v83_v49 }
  0xad   :  { %v172_v17 = vmul.f32 %v168_v15, %v124_v16 }
  0xaf   :  { %262 = vmatmul.f32.vlgmr.msra.gmra.mxu0 %v172_v17 }
 0x12a   :  { %v243_v19 = vpop.f32.mrf.mxu3 }
 0x12b   :  { %v244_v20 = vadd.f32 %v243_v19, %v223_v18 }
 0x12c   :  { %v263_v21 = vpop.f32.mrf.mxu0 }
 0x12d   :  { %v264_v22 = vadd.f32 %v263_v21, %v244_v20 }
 0x12f   :  { %267 = vst.msk [vmem:[#allocation2] sm:$0xff] %vm266_vm10, %v264_v22 }
 0x130   :  { %278 = dma.vmem_to_hbm [thread:$0]  %s274_s29, 128, %s276_s9, [#allocation3]  }
 0x131   :  { %324 = dma.done.wait [#allocation3], 128  }
 0x132   :  { %325 = vsyncadd [#allocation3], 4294967168 }
 0x133   :  { %283 = vsyncpa [#allocation3], 1 }

</bundles_post_ra>
